<compile_context>
chip_gen: v6e
topology: v6e:2x2x1
jax: 0.10.0
libtpu: 0.0.40
codegen_flags: <defaults>
</compile_context>

<pallas_src>
import functools

import jax
import jax.numpy as jnp
from jax.experimental import pallas as pl
from jax.experimental.pallas import tpu as pltpu

_LANE = 128  # vreg lane width; padded hidden / output width


def _round_up(n, m):
    return ((n + m - 1) // m) * m


def _mlp_kernel(xz_ref, w1_ref, b1_ref, w2_ref, b2_ref, w3_ref, b3_ref,
                o_ref, *, task_type):
    # Layer 1: (tile_B, Fin) @ (Fin, H1p). MXU accumulates in f32; bias + ReLU in f32.
    h1 = jnp.dot(xz_ref[...], w1_ref[...],
                 preferred_element_type=jnp.float32) + b1_ref[...]
    h1 = jnp.maximum(h1, 0.0)

    # Layer 2: (tile_B, H1p) @ (H1p, H2p).
    h2 = jnp.dot(h1.astype(w2_ref.dtype), w2_ref[...],
                 preferred_element_type=jnp.float32) + b2_ref[...]
    h2 = jnp.maximum(h2, 0.0)

    # Output layer, padded to 128 lanes: column 0 = real output, columns 1..127 = 0.
    out = jnp.dot(h2.astype(w3_ref.dtype), w3_ref[...],
                  preferred_element_type=jnp.float32) + b3_ref[...]

    if task_type == "classification":
        out = jax.nn.sigmoid(out)  # EUP; free bundle slot relative to VPU/MXU

    # Lane-dense (tile_B, 128) store — unmasked vst.
    o_ref[...] = out


def _pick_tile_b(requested_tile_b, batch, fin, matmul_bytes,
                 vmem_budget_bytes=12 * 1024 * 1024):
    """Largest batch tile (multiple of 8) that keeps the pipelined activation
    input (x2 double-buffer) + f32 output (x2) inside a conservative VMEM budget."""
    per_row = 2 * fin * matmul_bytes + 2 * _LANE * 4  # in dbl-buf + out dbl-buf
    max_rows = max(8, (vmem_budget_bytes // max(per_row, 1)) // 8 * 8)
    tile_b = min(requested_tile_b, max_rows, _round_up(batch, 8))
    return _round_up(tile_b, 8)


def mlp_net_forward(x, z, params, task_type="regression", tile_b=1024):
    """Pallas forward for MLP_Net.

    x: (B, Fx) f32, z: (B, Fz) f32.
    params: from prepare_params() — weights (in, out) padded to 128-wide
            hidden/output layers (matmul dtype, e.g. bf16), biases f32 (1, 128k).
    Returns (B, 1) float32.
    """
    w1, b1, w2, b2, w3, b3 = params
    matmul_dtype = w1.dtype

    # Concatenate once in the wrapper; kernel never does a lane-axis concat.
    xz = jnp.concatenate([x.astype(jnp.float32), z.astype(jnp.float32)],
                         axis=1).astype(matmul_dtype)
    B, fin = xz.shape
    out_w = w3.shape[1]  # padded output width (128)

    # Batch tiling: multiple of 8 sublanes, VMEM-budget aware; pad B up if needed.
    tile_b = _pick_tile_b(tile_b, B, fin, jnp.dtype(matmul_dtype).itemsize)
    b_pad = _round_up(B, tile_b)
    if b_pad != B:
        xz = jnp.pad(xz, ((0, b_pad - B), (0, 0)))
    grid = (b_pad // tile_b,)

    kernel = functools.partial(_mlp_kernel, task_type=task_type)

    out_padded = pl.pallas_call(
        kernel,
        out_shape=jax.ShapeDtypeStruct((b_pad, out_w), jnp.float32),
        grid_spec=pltpu.PrefetchScalarGridSpec(
            num_scalar_prefetch=0,
            grid=grid,
            in_specs=[
                # Activation tile: indexed by the batch grid axis (auto-pipelined).
                pl.BlockSpec((tile_b, fin), lambda i: (i, 0)),
                # Weights / biases: constant index_map -> fetched once, VMEM-resident.
                pl.BlockSpec(w1.shape, lambda i: (0, 0)),
                pl.BlockSpec(b1.shape, lambda i: (0, 0)),
                pl.BlockSpec(w2.shape, lambda i: (0, 0)),
                pl.BlockSpec(b2.shape, lambda i: (0, 0)),
                pl.BlockSpec(w3.shape, lambda i: (0, 0)),
                pl.BlockSpec(b3.shape, lambda i: (0, 0)),
            ],
            out_specs=pl.BlockSpec((tile_b, out_w), lambda i: (i, 0)),
        ),
        compiler_params=pltpu.CompilerParams(
            dimension_semantics=("parallel",),  # batch rows are independent
        ),
    )(xz, w1, b1, w2, b2, w3, b3)

    # Slice the real scalar output (column 0) and drop batch padding.
    return out_padded[:B, :1]


def init_params(key, x_feat, z_feat, hidden_units):
    """Raw f32 params mimicking PyTorch Linear default init U(-1/sqrt(fan_in), +1/sqrt(fan_in)).

    Weights stored as (in_features, out_features); biases as (1, out_features).
    """
    dims = [x_feat + z_feat] + list(hidden_units) + [1]
    params = []
    for i in range(len(dims) - 1):
        fan_in, fan_out = dims[i], dims[i + 1]
        key, kw, kb = jax.random.split(key, 3)
        bound = 1.0 / jnp.sqrt(jnp.float32(fan_in))
        w = jax.random.uniform(kw, (fan_in, fan_out), jnp.float32, -bound, bound)
        b = jax.random.uniform(kb, (1, fan_out), jnp.float32, -bound, bound)
        params.extend([w, b])
    return tuple(params)


def prepare_params(raw_params, matmul_dtype=jnp.bfloat16):
    """Zero-pad hidden/output widths to 128 lanes (bit-exact) and cast weights
    to the MXU input dtype. Biases stay f32 (elementwise math stays f32)."""
    w1, b1, w2, b2, w3, b3 = raw_params
    fin, h1 = w1.shape
    _, h2 = w2.shape
    h1p = _round_up(h1, _LANE)
    h2p = _round_up(h2, _LANE)
    outp = _LANE  # pad scalar output layer to a full lane width

    w1p = jnp.zeros((fin, h1p), jnp.float32).at[:, :h1].set(w1)
    b1p = jnp.zeros((1, h1p), jnp.float32).at[:, :h1].set(b1)
    w2p = jnp.zeros((h1p, h2p), jnp.float32).at[:h1, :h2].set(w2)
    b2p = jnp.zeros((1, h2p), jnp.float32).at[:, :h2].set(b2)
    w3p = jnp.zeros((h2p, outp), jnp.float32).at[:h2, :1].set(w3)
    b3p = jnp.zeros((1, outp), jnp.float32).at[:, :1].set(b3)

    return (w1p.astype(matmul_dtype), b1p,
            w2p.astype(matmul_dtype), b2p,
            w3p.astype(matmul_dtype), b3p)


def mlp_net_reference(x, z, prepared_params, task_type="regression"):
    """Pure-JAX reference using the SAME prepared (padded, bf16-weight) params
    and the same precision policy as the kernel."""
    w1, b1, w2, b2, w3, b3 = prepared_params
    md = w1.dtype
    h = jnp.concatenate([x, z], axis=1).astype(md)
    h = jnp.maximum(jnp.dot(h, w1, preferred_element_type=jnp.float32) + b1, 0.0)
    h = jnp.maximum(jnp.dot(h.astype(md), w2, preferred_element_type=jnp.float32) + b2, 0.0)
    out = jnp.dot(h.astype(md), w3, preferred_element_type=jnp.float32) + b3
    if task_type == "classification":
        out = jax.nn.sigmoid(out)
    return out[:, :1]


def mlp_net_reference_f32(x, z, raw_params, task_type="regression"):
    """Full-f32 reference matching the PyTorch module's math exactly."""
    w1, b1, w2, b2, w3, b3 = raw_params
    h = jnp.concatenate([x, z], axis=1)
    h = jnp.maximum(h @ w1 + b1, 0.0)
    h = jnp.maximum(h @ w2 + b2, 0.0)
    out = h @ w3 + b3
    if task_type == "classification":
        out = jax.nn.sigmoid(out)
    return out


if __name__ == "__main__":
    # Small shapes consistent with the module's forward:
    #   x: (batch, X_num_features), z: (batch, Z_num_features)
    B, Fx, Fz = 8, 4, 4
    hidden_units = [32, 32]

    key = jax.random.PRNGKey(0)
    kx, kz, kp = jax.random.split(key, 3)
    x = jax.random.normal(kx, (B, Fx), jnp.float32)
    z = jax.random.normal(kz, (B, Fz), jnp.float32)

    raw_params = init_params(kp, Fx, Fz, hidden_units)
    params = prepare_params(raw_params, matmul_dtype=jnp.bfloat16)

    # Regression head.
    out = mlp_net_forward(x, z, params, task_type="regression")
    out = jax.block_until_ready(out)
    assert out.shape == (B, 1)
    ref = mlp_net_reference(x, z, params, task_type="regression")
    assert jnp.allclose(out, ref, atol=1e-4, rtol=1e-4)
    ref_f32 = mlp_net_reference_f32(x, z, raw_params, task_type="regression")
    assert jnp.allclose(out, ref_f32, atol=5e-2, rtol=5e-2)  # bf16-matmul vs full-f32

    # Classification head (sigmoid epilogue).
    out_c = mlp_net_forward(x, z, params, task_type="classification")
    out_c = jax.block_until_ready(out_c)
    ref_c = mlp_net_reference(x, z, params, task_type="classification")
    assert jnp.allclose(out_c, ref_c, atol=1e-4, rtol=1e-4)

    print("KERNEL_OK")
</pallas_src>

<mosaic_0001>
module attributes {stable_mosaic.version = 11 : i64} {
  func.func @_mlp_kernel(%arg0: i32, %arg1: memref<8x8xbf16, #tpu.memory_space<vmem>>, %arg2: memref<8x128xbf16, #tpu.memory_space<vmem>>, %arg3: memref<1x128xf32, #tpu.memory_space<vmem>>, %arg4: memref<128x128xbf16, #tpu.memory_space<vmem>>, %arg5: memref<1x128xf32, #tpu.memory_space<vmem>>, %arg6: memref<128x128xbf16, #tpu.memory_space<vmem>>, %arg7: memref<1x128xf32, #tpu.memory_space<vmem>>, %arg8: memref<8x128xf32, #tpu.memory_space<vmem>>) attributes {dimension_semantics = [#tpu.dimension_semantics<parallel>], iteration_bounds = array<i64: 1>, scalar_prefetch = 0 : i64, scratch_operands = 0 : i64, tpu.core_type = #tpu.core_type<tc>, window_params = [{transform_indices = @transform_0, window_bounds = array<i64: 8, 8>}, {pipeline_mode = #tpu.pipeline_mode<synchronous>, transform_indices = @transform_1, window_bounds = array<i64: 8, 128>}, {pipeline_mode = #tpu.pipeline_mode<synchronous>, transform_indices = @transform_2, window_bounds = array<i64: 1, 128>}, {pipeline_mode = #tpu.pipeline_mode<synchronous>, transform_indices = @transform_3, window_bounds = array<i64: 128, 128>}, {pipeline_mode = #tpu.pipeline_mode<synchronous>, transform_indices = @transform_4, window_bounds = array<i64: 1, 128>}, {pipeline_mode = #tpu.pipeline_mode<synchronous>, transform_indices = @transform_5, window_bounds = array<i64: 128, 128>}, {pipeline_mode = #tpu.pipeline_mode<synchronous>, transform_indices = @transform_6, window_bounds = array<i64: 1, 128>}, {transform_indices = @transform_7, window_bounds = array<i64: 8, 128>}]} {
    %c0 = arith.constant 0 : index
    %c0_0 = arith.constant 0 : index
    %0 = vector.load %arg1[%c0, %c0_0] : memref<8x8xbf16, #tpu.memory_space<vmem>>, vector<8x8xbf16>
    %c0_1 = arith.constant 0 : index
    %c0_2 = arith.constant 0 : index
    %1 = vector.load %arg2[%c0_1, %c0_2] : memref<8x128xbf16, #tpu.memory_space<vmem>>, vector<8x128xbf16>
    %cst = arith.constant dense<0.000000e+00> : vector<8x128xf32>
    %2 = tpu.matmul %0, %1, %cst {dimension_numbers = #tpu.dot_dimension_numbers<[1], [0], [0], [1], [0, 0, 1, 1], [], []>} : vector<8x8xbf16>, vector<8x128xbf16>, vector<8x128xf32> -> vector<8x128xf32>
    %c0_3 = arith.constant 0 : index
    %c0_4 = arith.constant 0 : index
    %3 = vector.load %arg3[%c0_3, %c0_4] : memref<1x128xf32, #tpu.memory_space<vmem>>, vector<1x128xf32>
    %4 = vector.broadcast %3 : vector<1x128xf32> to vector<8x128xf32>
    %5 = arith.addf %2, %4 : vector<8x128xf32>
    %cst_5 = arith.constant 0.000000e+00 : f32
    %6 = vector.broadcast %cst_5 : f32 to vector<8x128xf32>
    %7 = arith.maximumf %5, %6 : vector<8x128xf32>
    %8 = arith.truncf %7 : vector<8x128xf32> to vector<8x128xbf16>
    %c0_6 = arith.constant 0 : index
    %c0_7 = arith.constant 0 : index
    %9 = vector.load %arg4[%c0_6, %c0_7] : memref<128x128xbf16, #tpu.memory_space<vmem>>, vector<128x128xbf16>
    %cst_8 = arith.constant dense<0.000000e+00> : vector<8x128xf32>
    %10 = tpu.matmul %8, %9, %cst_8 {dimension_numbers = #tpu.dot_dimension_numbers<[1], [0], [0], [1], [0, 0, 1, 1], [], []>} : vector<8x128xbf16>, vector<128x128xbf16>, vector<8x128xf32> -> vector<8x128xf32>
    %c0_9 = arith.constant 0 : index
    %c0_10 = arith.constant 0 : index
    %11 = vector.load %arg5[%c0_9, %c0_10] : memref<1x128xf32, #tpu.memory_space<vmem>>, vector<1x128xf32>
    %12 = vector.broadcast %11 : vector<1x128xf32> to vector<8x128xf32>
    %13 = arith.addf %10, %12 : vector<8x128xf32>
    %cst_11 = arith.constant 0.000000e+00 : f32
    %14 = vector.broadcast %cst_11 : f32 to vector<8x128xf32>
    %15 = arith.maximumf %13, %14 : vector<8x128xf32>
    %16 = arith.truncf %15 : vector<8x128xf32> to vector<8x128xbf16>
    %c0_12 = arith.constant 0 : index
    %c0_13 = arith.constant 0 : index
    %17 = vector.load %arg6[%c0_12, %c0_13] : memref<128x128xbf16, #tpu.memory_space<vmem>>, vector<128x128xbf16>
    %cst_14 = arith.constant dense<0.000000e+00> : vector<8x128xf32>
    %18 = tpu.matmul %16, %17, %cst_14 {dimension_numbers = #tpu.dot_dimension_numbers<[1], [0], [0], [1], [0, 0, 1, 1], [], []>} : vector<8x128xbf16>, vector<128x128xbf16>, vector<8x128xf32> -> vector<8x128xf32>
    %c0_15 = arith.constant 0 : index
    %c0_16 = arith.constant 0 : index
    %19 = vector.load %arg7[%c0_15, %c0_16] : memref<1x128xf32, #tpu.memory_space<vmem>>, vector<1x128xf32>
    %20 = vector.broadcast %19 : vector<1x128xf32> to vector<8x128xf32>
    %21 = arith.addf %18, %20 : vector<8x128xf32>
    %c0_17 = arith.constant 0 : index
    %c0_18 = arith.constant 0 : index
    %22 = vector.load %arg8[%c0_17, %c0_18] : memref<8x128xf32, #tpu.memory_space<vmem>>, vector<8x128xf32>
    tpu.vector_store %arg8[%c0_17, %c0_18], %21 {strides = array<i32>} : memref<8x128xf32, #tpu.memory_space<vmem>>, vector<8x128xf32>,
    return
  }
  func.func @transform_0(%arg0: i32) -> (i32, i32) {
    %c0_i32 = arith.constant 0 : i32
    %c0_i32_0 = arith.constant 0 : i32
    return %arg0, %c0_i32 : i32, i32
  }
  func.func @transform_1(%arg0: i32) -> (i32, i32) {
    %c0_i32 = arith.constant 0 : i32
    %c0_i32_0 = arith.constant 0 : i32
    %c0_i32_1 = arith.constant 0 : i32
    return %c0_i32, %c0_i32_0 : i32, i32
  }
  func.func @transform_2(%arg0: i32) -> (i32, i32) {
    %c0_i32 = arith.constant 0 : i32
    %c0_i32_0 = arith.constant 0 : i32
    %c0_i32_1 = arith.constant 0 : i32
    return %c0_i32, %c0_i32_0 : i32, i32
  }
  func.func @transform_3(%arg0: i32) -> (i32, i32) {
    %c0_i32 = arith.constant 0 : i32
    %c0_i32_0 = arith.constant 0 : i32
    %c0_i32_1 = arith.constant 0 : i32
    return %c0_i32, %c0_i32_0 : i32, i32
  }
  func.func @transform_4(%arg0: i32) -> (i32, i32) {
    %c0_i32 = arith.constant 0 : i32
    %c0_i32_0 = arith.constant 0 : i32
    %c0_i32_1 = arith.constant 0 : i32
    return %c0_i32, %c0_i32_0 : i32, i32
  }
  func.func @transform_5(%arg0: i32) -> (i32, i32) {
    %c0_i32 = arith.constant 0 : i32
    %c0_i32_0 = arith.constant 0 : i32
    %c0_i32_1 = arith.constant 0 : i32
    return %c0_i32, %c0_i32_0 : i32, i32
  }
  func.func @transform_6(%arg0: i32) -> (i32, i32) {
    %c0_i32 = arith.constant 0 : i32
    %c0_i32_0 = arith.constant 0 : i32
    %c0_i32_1 = arith.constant 0 : i32
    return %c0_i32, %c0_i32_0 : i32, i32
  }
  func.func @transform_7(%arg0: i32) -> (i32, i32) {
    %c0_i32 = arith.constant 0 : i32
    %c0_i32_0 = arith.constant 0 : i32
    return %arg0, %c0_i32 : i32, i32
  }
}

</mosaic_0001>

<bundles_post_ra>
// kernel: tpu_custom_call.1
= control target key start
LH: loop header
LB: loop body
LE: loop exit
PB: predicated region body
PF: predicated region fallthrough
CT: control target
= control target key end

     0   :  { %12 = vsyncpa [#allocation3], 0  ;;  %s695_s0 = inlined_call_operand.hbm [shape: bf16[8,8], index: 0, kind: input, shape index: {}]   ;;  %s696_s1 = inlined_call_operand.hbm [shape: bf16[8,128], index: 1, kind: input, shape index: {}]   ;;  %s697_s2 = inlined_call_operand.vmem [shape: f32[1,128], index: 2, kind: input, shape index: {}]   ;;  %s698_s3 = inlined_call_operand.hbm [shape: bf16[128,128], index: 3, kind: input, shape index: {}]   ;;  %s699_s4 = inlined_call_operand.vmem [shape: f32[1,128], index: 4, kind: input, shape index: {}]   ;;  %s700_s5 = inlined_call_operand.hbm [shape: bf16[128,128], index: 5, kind: input, shape index: {}]   ;;  %s701_s6 = inlined_call_operand.vmem [shape: f32[1,128], index: 6, kind: input, shape index: {}]   ;;  %s702_s7 = inlined_call_operand.hbm [shape: f32[8,128], index: 7, kind: output, shape index: {}]  }
   0x1   :  { %13 = vsyncpa [#allocation6], 0 }
   0x2   :  { %14 = vsyncpa [#allocation9], 0 }
   0x3   :  { %15 = vsyncpa [#allocation4], 0  ;;  %s599_s24 = smov [#allocation5]   ;;  %s600_s26 = smov [#allocation2]  }
   0x4   :  { %s32_s25 = sshll.u32 %s599_s24, 4  ;;  %s22_s27 = sshll.u32 %s600_s26, 4  ;;  %s33_s25 = int_to_ptr.vmem [resolvable:$true] %s32_s25  ;;  %s23_s27 = int_to_ptr.vmem [resolvable:$true] %s22_s27 }
   0x5   :  { %s499_s28 = scalar_lea.vmem %s33_s25, 64  ;;  %p504_p1 = scmp.lt.s32.totalorder %s33_s25, %s33_s25 }
   0x6   :  { %p500_p0 = scmp.ne.s32.totalorder %s33_s25, %s499_s28  ;;  %p505_p2 = scmp.lt.s32.totalorder %s499_s28, %s499_s28 }
   0x8   :  { %p506_p3 = por %p505_p2, %p504_p1 }
   0xa   :  { %p507_p4 = pnand %p506_p3, %p500_p0 }
   0xc   :  { %510 = shalt.err (!%p507_p4)
}
   0xd   :  { %35 = dma.hbm_to_vmem [thread:$0]  %s696_s1, 64, %s33_s25, [#allocation6]  }
   0xe   :  { %s519_s8 = scalar_lea.vmem %s23_s27, 64  ;;  %p524_p6 = scmp.lt.s32.totalorder %s23_s27, %s23_s27 }
   0xf   :  { %p520_p5 = scmp.ne.s32.totalorder %s23_s27, %s519_s8  ;;  %p525_p7 = scmp.lt.s32.totalorder %s519_s8, %s519_s8 }
  0x11   :  { %p526_p8 = por %p525_p7, %p524_p6 }
  0x13   :  { %p527_p9 = pnand %p526_p8, %p520_p5 }
  0x15   :  { %530 = shalt.err (!%p527_p9)
}
  0x16   :  { %25 = dma.hbm_to_vmem [thread:$0]  %s695_s0, 64, %s23_s27, [#allocation3]  }
  0x17   :  { %s601_s11 = smov [#allocation7]  }
  0x18   :  { %s43_s12 = sshll.u32 %s601_s11, 4  ;;  %s44_s12 = int_to_ptr.vmem [resolvable:$true] %s43_s12 }
  0x19   :  { %s539_s13 = scalar_lea.vmem %s44_s12, 1024  ;;  %p544_p11 = scmp.lt.s32.totalorder %s44_s12, %s44_s12 }
  0x1a   :  { %p540_p10 = scmp.ne.s32.totalorder %s44_s12, %s539_s13  ;;  %p545_p12 = scmp.lt.s32.totalorder %s539_s13, %s539_s13 }
  0x1c   :  { %p546_p13 = por %p545_p12, %p544_p11 }
  0x1e   :  { %p547_p0 = pnand %p546_p13, %p540_p10 }
  0x20   :  { %550 = shalt.err (!%p547_p0)
}
  0x21   :  { %s602_s1 = smov 64   ;;  %s603_s14 = smov 4  }
  0x22   :  { %49 = dma.hbm_to_vmem [thread:$0]  %s698_s3, 1024, %s44_s12, [#allocation6], %s602_s1, %s602_s1, %s603_s14  }
  0x23   :  { %s604_s17 = smov [#allocation8]  }
  0x24   :  { %s57_s18 = sshll.u32 %s604_s17, 4  ;;  %s58_s18 = int_to_ptr.vmem [resolvable:$true] %s57_s18 }
  0x25   :  { %s559_s0 = scalar_lea.vmem %s58_s18, 1024  ;;  %p564_p2 = scmp.lt.s32.totalorder %s58_s18, %s58_s18 }
  0x26   :  { %p560_p1 = scmp.ne.s32.totalorder %s58_s18, %s559_s0  ;;  %p565_p3 = scmp.lt.s32.totalorder %s559_s0, %s559_s0 }
  0x28   :  { %p566_p4 = por %p565_p3, %p564_p2 }
  0x2a   :  { %p567_p5 = pnand %p566_p4, %p560_p1 }
  0x2c   :  { %570 = shalt.err (!%p567_p5)
}
  0x2d   :  { %63 = dma.hbm_to_vmem [thread:$0]  %s700_s5, 1024, %s58_s18, [#allocation9], %s602_s1, %s602_s1, %s603_s14  }
  0x2e   :  { %591 = dma.done.wait [#allocation3], 64  }
  0x2f   :  { %592 = vsyncadd [#allocation3], 4294967232 }
  0x30   :  { %593 = dma.done.wait [#allocation6], 1088  }
  0x31   :  { %594 = vsyncadd [#allocation6], 4294966208 }
  0x32   :  { %595 = dma.done.wait [#allocation9], 1024  }
  0x33   :  { %596 = vsyncadd [#allocation9], 4294966272  ;;  %v605_v0 = vmov 0.0   ;;  %vm606_vm0 = vmmov 0   ;;  %vm92_vm1 = vcmask 1043456   ;;  %vm88_vm2 = vcmask 64512  }
  0x34   :  { %420 = vmatprep.subr.bf16.mxu0 %v605_v0  ;;  %422 = vmatprep.mubr.msk.bf16.mxu0 %vm606_vm0, %v605_v0  ;;  %v80_v1 = vld [vmem:[#allocation5] sm:$0xf]  ;;  %v79_v4 = vld [vmem:[#allocation2] sm:$0xf]  ;;  %v476_v5 = vld [vmem:[#allocation7 + $0x30] sm:$0xff]   ;;  %s607_s24 = smov [#allocation10]  }
  0x35   :  { %426 = vmatprep.subr.bf16.mxu1 %v605_v0  ;;  %442 = vmatprep.mubr.msk.bf16.mxu1 %vm606_vm0, %v605_v0  ;;  %v94_v2 = vsel %vm92_vm1, %v80_v1, 0  ;;  %v475_v3 = vld [vmem:[#allocation7 + $0x38] sm:$0xff]   ;;  %v477_v6 = vld [vmem:[#allocation7 + $0x28] sm:$0xff]   ;;  %v478_v7 = vld [vmem:[#allocation7 + $0x20] sm:$0xff]   ;;  %s369_s25 = sshll.u32 %s607_s24, 4  ;;  %s370_s25 = int_to_ptr.vmem [resolvable:$true] %s369_s25 }
  0x36   :  { %421 = vmatpush3.bf16.msra.mxu0 %v94_v2  ;;  %427 = vmatpush3.bf16.msra.mxu1 %v475_v3  ;;  %v479_v8 = vld [vmem:[#allocation7 + $0x18] sm:$0xff]   ;;  %v480_v9 = vld [vmem:[#allocation7 + $0x10] sm:$0xff]   ;;  %v481_v10 = vld [vmem:[#allocation7 + $0x8] sm:$0xff]   ;;  %p576_p7 = scmp.lt.s32.totalorder %s370_s25, %s370_s25 }
  0x37   :  { %446 = vmatprep.subr.bf16.mxu0 %v605_v0  ;;  %428 = vmatprep.subr.bf16.mxu1 %v605_v0  ;;  %v482_v11 = vld [vmem:[#allocation7] sm:$0xff]   ;;  %v483_v12 = vld [vmem:[#allocation8 + $0x38] sm:$0xff]   ;;  %v484_v13 = vld [vmem:[#allocation8 + $0x30] sm:$0xff]  }
  0x38   :  { %v485_v14 = vld [vmem:[#allocation8 + $0x28] sm:$0xff]   ;;  %v486_v15 = vld [vmem:[#allocation8 + $0x20] sm:$0xff]   ;;  %v487_v16 = vld [vmem:[#allocation8 + $0x18] sm:$0xff]  }
  0x39   :  { %423 = vmatmul.mubr.msk.bf16.vlgmr.msra.gmra.mxu0 %vm88_vm2, %v79_v4  ;;  %v488_v17 = vld [vmem:[#allocation8 + $0x10] sm:$0xff]   ;;  %v380_v18 = vld [vmem:[%s697_s2] ss:$0 sm:$0xff]  ;;  %v489_v26 = vld [vmem:[#allocation8 + $0x8] sm:$0xff]  }
  0x3a   :  { %462 = vmatprep.mubr.msk.bf16.mxu0 %vm606_vm0, %v605_v0  ;;  %429 = vmatpush3.bf16.msra.mxu1 %v476_v5  ;;  %v490_v27 = vld [vmem:[#allocation8] sm:$0xff]   ;;  %v382_v28 = vld [vmem:[%s699_s4] ss:$0 sm:$0xff]  ;;  %s571_s4 = scalar_lea.vmem %s370_s25, 128 }
  0x3b   :  { %430 = vmatprep.subr.bf16.mxu1 %v605_v0  ;;  %447 = vmatpush3.bf16.msra.mxu0 %v483_v12  ;;  %v391_v36 = vld [vmem:[%s701_s6] ss:$0 sm:$0xff]  ;;  %p572_p6 = scmp.ne.s32.totalorder %s370_s25, %s571_s4  ;;  %p577_p8 = scmp.lt.s32.totalorder %s571_s4, %s571_s4 }
  0x3c   :  { %448 = vmatprep.subr.bf16.mxu0 %v605_v0 }
  0x3d   :  { %p578_p9 = por %p577_p8, %p576_p7 }
  0x3e   :  { %431 = vmatpush3.bf16.msra.mxu1 %v477_v6 }
  0x3f   :  { %432 = vmatprep.subr.bf16.mxu1 %v605_v0  ;;  %449 = vmatpush3.bf16.msra.mxu0 %v484_v13  ;;  %p579_p10 = pnand %p578_p9, %p572_p6 }
  0x40   :  { %450 = vmatprep.subr.bf16.mxu0 %v605_v0 }
  0x42   :  { %433 = vmatpush3.bf16.msra.mxu1 %v478_v7 }
  0x43   :  { %434 = vmatprep.subr.bf16.mxu1 %v605_v0  ;;  %451 = vmatpush3.bf16.msra.mxu0 %v485_v14 }
  0x44   :  { %452 = vmatprep.subr.bf16.mxu0 %v605_v0 }
  0x46   :  { %435 = vmatpush3.bf16.msra.mxu1 %v479_v8 }
  0x47   :  { %436 = vmatprep.subr.bf16.mxu1 %v605_v0  ;;  %453 = vmatpush3.bf16.msra.mxu0 %v486_v15 }
  0x48   :  { %454 = vmatprep.subr.bf16.mxu0 %v605_v0 }
  0x4a   :  { %437 = vmatpush3.bf16.msra.mxu1 %v480_v9 }
  0x4b   :  { %438 = vmatprep.subr.bf16.mxu1 %v605_v0  ;;  %455 = vmatpush3.bf16.msra.mxu0 %v487_v16 }
  0x4c   :  { %456 = vmatprep.subr.bf16.mxu0 %v605_v0 }
  0x4e   :  { %439 = vmatpush3.bf16.msra.mxu1 %v481_v10 }
  0x4f   :  { %440 = vmatprep.subr.bf16.mxu1 %v605_v0  ;;  %457 = vmatpush3.bf16.msra.mxu0 %v488_v17 }
  0x50   :  { %458 = vmatprep.subr.bf16.mxu0 %v605_v0 }
  0x52   :  { %441 = vmatpush3.bf16.msra.mxu1 %v482_v11 }
  0x53   :  { %459 = vmatpush3.bf16.msra.mxu0 %v489_v26 }
  0x54   :  { %460 = vmatprep.subr.bf16.mxu0 %v605_v0 }
  0x57   :  { %461 = vmatpush3.bf16.msra.mxu0 %v490_v27 }
  0xf9   :  { %v130_v19 = vpop.f32.mrf.mxu0 }
  0xfa   :  { %v131_v20 = vadd.f32 %v380_v18, %v130_v19 }
  0xfb   :  { %v424_v21 = vpop.f32.mrf.mxu0 }
  0xfc   :  { %v136_v22 = vmax.f32 %v131_v20, 0.0 }
  0xfd   :  { %v133_v23 = vpop.f32.mrf.mxu0 }
  0xfe   :  { %v137_v24 = vpack.c.bf16 %v136_v22, %v136_v22 }
  0xff   :  { %v425_v25 = vpop.f32.mrf.mxu0 }
 0x100   :  { %443 = vmatmul.mubr.bf16.vlgmr.msra.gmra.mxu1 %v137_v24 }
 0x1c0   :  { %v243_v29 = vpop.f32.mrf.mxu1 }
 0x1c1   :  { %v244_v30 = vadd.f32 %v382_v28, %v243_v29 }
 0x1c2   :  { %v444_v31 = vpop.f32.mrf.mxu1 }
 0x1c3   :  { %v249_v32 = vmax.f32 %v244_v30, 0.0 }
 0x1c4   :  { %v246_v33 = vpop.f32.mrf.mxu1 }
 0x1c5   :  { %v250_v34 = vpack.c.bf16 %v249_v32, %v249_v32 }
 0x1c6   :  { %v445_v35 = vpop.f32.mrf.mxu1 }
 0x1c7   :  { %463 = vmatmul.mubr.bf16.vlgmr.msra.gmra.mxu0 %v250_v34 }
 0x287   :  { %v356_v37 = vpop.f32.mrf.mxu0 }
 0x288   :  { %v357_v38 = vadd.f32 %v391_v36, %v356_v37 }
 0x289   :  { %v464_v39 = vpop.f32.mrf.mxu0 }
 0x28a   :  { %362 = vst [vmem:[#allocation10] sm:$0xff] %v357_v38 }
 0x28b   :  { %v359_v40 = vpop.f32.mrf.mxu0 }
 0x28c   :  { %582 = shalt.err (!%p579_p10)
}
 0x28d   :  { %372 = dma.vmem_to_hbm [thread:$0]  %s370_s25, 128, %s702_s7, [#allocation4]   ;;  %v465_v41 = vpop.f32.mrf.mxu0 }
 0x28e   :  { %597 = dma.done.wait [#allocation4], 128  }
 0x28f   :  { %598 = vsyncadd [#allocation4], 4294967168 }
 0x290   :  { %376 = vsyncpa [#allocation3], 1 }
 0x291   :  { %377 = vsyncpa [#allocation6], 1 }
 0x292   :  { %378 = vsyncpa [#allocation9], 1 }
 0x293   :  { %379 = vsyncpa [#allocation4], 1 }

</bundles_post_ra>
